<compile_context>
chip_gen: v7x
topology: tpu7x:2x2x1
jax: 0.10.0
libtpu: 0.0.40
codegen_flags: <defaults>
</compile_context>

<pallas_src>
import functools

import jax
import jax.numpy as jnp
from jax.experimental import pallas as pl
from jax.experimental.pallas import tpu as pltpu


def _round_up(n, m):
    return (n + m - 1) // m * m


def _pick_batch_tile(B):
    if B <= 8:
        return B
    for t in (64, 32, 16, 8):
        if B % t == 0:
            return t
    return B


def _pick_spatial_tile(S, max_ts):
    """Largest multiple of 8 that divides S and is <= max_ts, else S."""
    if S <= max_ts:
        return S
    t = (max_ts // 8) * 8
    while t >= 8:
        if S % t == 0:
            return t
        t -= 8
    return S


def _combined_kernel(x_ref, wcat_ref, bcat_ref, wgvr_ref, bgvr_ref,
                     o_ref, acc_ref, *, inv_spatial, ncp):
    s = pl.program_id(1)

    @pl.when(s == 0)
    def _():
        acc_ref[...] = jnp.zeros_like(acc_ref)

    # Partial global-average-pool. x tile is channels-last (TB, TS, C), so the
    # reduction is over the sublane axis and C stays on the 128-lane axis.
    x = x_ref[...].astype(jnp.float32)
    acc_ref[...] += jnp.sum(x, axis=1)

    @pl.when(s == pl.num_programs(1) - 1)
    def _():
        pooled = acc_ref[...] * inv_spatial                      # (TB, C)

        # Fused classifier heads: combined = [out1 | out2 | out3], each head
        # occupying a lane-padded block of width ncp.
        combined = (jnp.dot(pooled, wcat_ref[...],
                            preferred_element_type=jnp.float32)
                    + bcat_ref[...])                             # (TB, 3*ncp)

        # Fused gate / value / residual matmul: y = [gate_pre | val | res].
        y = (jnp.dot(combined, wgvr_ref[...],
                     preferred_element_type=jnp.float32)
             + bgvr_ref[...])                                    # (TB, 3*ncp)

        gate = jax.nn.sigmoid(y[:, :ncp])
        val = y[:, ncp:2 * ncp]
        res = y[:, 2 * ncp:]
        o_ref[...] = (gate * val + res).astype(o_ref.dtype)


def _fuse_params(params):
    """Build the two fused weight matrices (lane-padded to NCP = roundup(nc, 128))."""
    (w1, b1, w2, b2, w3, b3, wg, bg, wv, bv) = params
    _, nc = w1.shape
    ncp = _round_up(nc, 128)

    def pad_cols(m):
        return jnp.pad(m.astype(jnp.float32), ((0, 0), (0, ncp - nc)))

    # Heads: (C, 3*ncp); head i occupies lanes [i*ncp, i*ncp + nc).
    wcat = jnp.concatenate([pad_cols(w1), pad_cols(w2), pad_cols(w3)], axis=1)
    bcat = jnp.concatenate([pad_cols(b1), pad_cols(b2), pad_cols(b3)], axis=1)

    def expand_rows(w):
        # (3*nc, nc) -> (3*ncp, ncp): each nc-row block moves to the head of
        # its ncp-row block; columns zero-padded to ncp.
        out = jnp.zeros((3 * ncp, ncp), jnp.float32)
        for i in range(3):
            out = out.at[i * ncp:i * ncp + nc, :nc].set(
                w[i * nc:(i + 1) * nc].astype(jnp.float32))
        return out

    # Residual: (out1 + out2 + out3) / 3 expressed as MXU work.
    residual = jnp.tile(jnp.eye(ncp, dtype=jnp.float32) / 3.0, (3, 1))

    wgvr = jnp.concatenate([expand_rows(wg), expand_rows(wv), residual], axis=1)
    bgvr = jnp.concatenate([pad_cols(bg), pad_cols(bv),
                            jnp.zeros((1, ncp), jnp.float32)], axis=1)
    return wcat, bcat, wgvr, bgvr, nc, ncp


def combined_model_forward(x, params):
    """x: (B, C, H, W) float32 (NCHW). Returns (B, num_classes) float32."""
    B, C, H, W = x.shape
    S = H * W

    # Channels-last for the kernel (layout plumbing only; realistic RegNet C is
    # >= 128 so the lane axis is dense there).
    x_cl = jnp.transpose(x.reshape(B, C, S), (0, 2, 1))          # (B, S, C)

    wcat, bcat, wgvr, bgvr, nc, ncp = _fuse_params(params)

    TB = _pick_batch_tile(B)
    itemsize = jnp.dtype(x_cl.dtype).itemsize
    # Keep the per-step x tile <= ~8 MiB (Pallas double-buffers it), so the
    # pipeline also fits comfortably on v7x's 64 MiB VMEM.
    max_ts = max(8, (8 * 1024 * 1024 // max(1, TB * C * itemsize)) // 8 * 8)
    TS = _pick_spatial_tile(S, max_ts)

    grid = (B // TB, S // TS)

    kernel = functools.partial(_combined_kernel, inv_spatial=1.0 / S, ncp=ncp)

    out = pl.pallas_call(
        kernel,
        out_shape=jax.ShapeDtypeStruct((B, ncp), jnp.float32),
        grid_spec=pltpu.PrefetchScalarGridSpec(
            num_scalar_prefetch=0,
            grid=grid,
            in_specs=[
                pl.BlockSpec((TB, TS, C), lambda b, s: (b, s, 0)),       # x
                pl.BlockSpec((C, 3 * ncp), lambda b, s: (0, 0)),         # Wcat
                pl.BlockSpec((1, 3 * ncp), lambda b, s: (0, 0)),         # bcat
                pl.BlockSpec((3 * ncp, 3 * ncp), lambda b, s: (0, 0)),   # Wgvr
                pl.BlockSpec((1, 3 * ncp), lambda b, s: (0, 0)),         # bgvr
            ],
            out_specs=pl.BlockSpec((TB, ncp), lambda b, s: (b, 0)),
            scratch_shapes=[pltpu.VMEM((TB, C), jnp.float32)],
        ),
        compiler_params=pltpu.CompilerParams(
            dimension_semantics=("parallel", "arbitrary"),
            vmem_limit_bytes=48 * 1024 * 1024,
        ),
    )(x_cl, wcat, bcat, wgvr, bgvr)

    return out[:, :nc]


def make_params(key, C, num_classes):
    """Deterministic parameter construction (linear weights stored transposed)."""
    ks = jax.random.split(key, 10)
    sc1 = 1.0 / jnp.sqrt(C)
    sc2 = 1.0 / jnp.sqrt(3 * num_classes)
    w1 = jax.random.normal(ks[0], (C, num_classes), jnp.float32) * sc1
    b1 = jax.random.normal(ks[1], (1, num_classes), jnp.float32) * 0.01
    w2 = jax.random.normal(ks[2], (C, num_classes), jnp.float32) * sc1
    b2 = jax.random.normal(ks[3], (1, num_classes), jnp.float32) * 0.01
    w3 = jax.random.normal(ks[4], (C, num_classes), jnp.float32) * sc1
    b3 = jax.random.normal(ks[5], (1, num_classes), jnp.float32) * 0.01
    wg = jax.random.normal(ks[6], (3 * num_classes, num_classes), jnp.float32) * sc2
    bg = jax.random.normal(ks[7], (1, num_classes), jnp.float32) * 0.01
    wv = jax.random.normal(ks[8], (3 * num_classes, num_classes), jnp.float32) * sc2
    bv = jax.random.normal(ks[9], (1, num_classes), jnp.float32) * 0.01
    return (w1, b1, w2, b2, w3, b3, wg, bg, wv, bv)


def reference_forward(x, params):
    """Pure-JAX reference mirroring the PyTorch forward."""
    (w1, b1, w2, b2, w3, b3, wg, bg, wv, bv) = params
    pooled = jnp.mean(x, axis=(2, 3))                  # GAP (NCHW)
    out1 = pooled @ w1 + b1
    out2 = pooled @ w2 + b2
    out3 = pooled @ w3 + b3
    combined = jnp.concatenate([out1, out2, out3], axis=1)
    head = jax.nn.sigmoid(combined @ wg + bg) * (combined @ wv + bv)
    return head + out1 / 3.0 + out2 / 3.0 + out3 / 3.0


if __name__ == "__main__":
    B, C, H, W = 2, 4, 16, 16
    num_classes = 8

    key = jax.random.PRNGKey(0)
    kx, kp = jax.random.split(key)
    x = jax.random.normal(kx, (B, C, H, W), jnp.float32)
    params = make_params(kp, C, num_classes)

    out = combined_model_forward(x, params)
    out = jax.block_until_ready(out)

    ref = reference_forward(x, params)
    assert out.shape == (B, num_classes)
    assert jnp.allclose(out, ref, atol=1e-5, rtol=1e-5), "mismatch vs reference"

    print("KERNEL_OK")
</pallas_src>

<mosaic_0001>
module attributes {stable_mosaic.version = 11 : i64} {
  func.func @_combined_kernel(%arg0: i32, %arg1: i32, %arg2: memref<2x256x4xf32, #tpu.memory_space<vmem>>, %arg3: memref<4x384xf32, #tpu.memory_space<vmem>>, %arg4: memref<1x384xf32, #tpu.memory_space<vmem>>, %arg5: memref<384x384xf32, #tpu.memory_space<vmem>>, %arg6: memref<1x384xf32, #tpu.memory_space<vmem>>, %arg7: memref<2x128xf32, #tpu.memory_space<vmem>>, %arg8: memref<2x4xf32, #tpu.memory_space<vmem>>) attributes {dimension_semantics = [#tpu.dimension_semantics<parallel>, #tpu.dimension_semantics<arbitrary>], iteration_bounds = array<i64: 1, 1>, scalar_prefetch = 0 : i64, scratch_operands = 1 : i64, tpu.core_type = #tpu.core_type<tc>, window_params = [{transform_indices = @transform_0, window_bounds = array<i64: 2, 256, 4>}, {pipeline_mode = #tpu.pipeline_mode<synchronous>, transform_indices = @transform_1, window_bounds = array<i64: 4, 384>}, {pipeline_mode = #tpu.pipeline_mode<synchronous>, transform_indices = @transform_2, window_bounds = array<i64: 1, 384>}, {pipeline_mode = #tpu.pipeline_mode<synchronous>, transform_indices = @transform_3, window_bounds = array<i64: 384, 384>}, {pipeline_mode = #tpu.pipeline_mode<synchronous>, transform_indices = @transform_4, window_bounds = array<i64: 1, 384>}, {transform_indices = @transform_5, window_bounds = array<i64: 2, 128>}]} {
    %c0_i32 = arith.constant 0 : i32
    %0 = arith.cmpi eq, %arg1, %c0_i32 : i32
    %1 = arith.extui %0 : i1 to i32
    %c0_i32_0 = arith.constant 0 : i32
    %2 = arith.cmpi ne, %1, %c0_i32_0 : i32
    scf.if %2 {
      %cst_9 = arith.constant 0.000000e+00 : f32
      %11 = vector.broadcast %cst_9 : f32 to vector<2x4xf32>
      %c0_10 = arith.constant 0 : index
      %c0_11 = arith.constant 0 : index
      %12 = vector.load %arg8[%c0_10, %c0_11] : memref<2x4xf32, #tpu.memory_space<vmem>>, vector<2x4xf32>
      tpu.vector_store %arg8[%c0_10, %c0_11], %11 {strides = array<i32>} : memref<2x4xf32, #tpu.memory_space<vmem>>, vector<2x4xf32>,
    } else {
    }
    %c0 = arith.constant 0 : index
    %c0_1 = arith.constant 0 : index
    %c0_2 = arith.constant 0 : index
    %3 = vector.load %arg2[%c0, %c0_1, %c0_2] : memref<2x256x4xf32, #tpu.memory_space<vmem>>, vector<2x256x4xf32>
    %c0_3 = arith.constant 0 : index
    %c0_4 = arith.constant 0 : index
    %4 = vector.load %arg8[%c0_3, %c0_4] : memref<2x4xf32, #tpu.memory_space<vmem>>, vector<2x4xf32>
    %cst = arith.constant dense<0.000000e+00> : vector<2x4xf32>
    %5 = vector.multi_reduction <add>, %3, %cst [1] : vector<2x256x4xf32> to vector<2x4xf32>
    %6 = arith.addf %4, %5 : vector<2x4xf32>
    %c0_5 = arith.constant 0 : index
    %c0_6 = arith.constant 0 : index
    %7 = vector.load %arg8[%c0_5, %c0_6] : memref<2x4xf32, #tpu.memory_space<vmem>>, vector<2x4xf32>
    tpu.vector_store %arg8[%c0_5, %c0_6], %6 {strides = array<i32>} : memref<2x4xf32, #tpu.memory_space<vmem>>, vector<2x4xf32>,
    %c0_i32_7 = arith.constant 0 : i32
    %8 = arith.cmpi eq, %arg1, %c0_i32_7 : i32
    %9 = arith.extui %8 : i1 to i32
    %c0_i32_8 = arith.constant 0 : i32
    %10 = arith.cmpi ne, %9, %c0_i32_8 : i32
    scf.if %10 {
      %c0_9 = arith.constant 0 : index
      %c0_10 = arith.constant 0 : index
      %11 = vector.load %arg8[%c0_9, %c0_10] : memref<2x4xf32, #tpu.memory_space<vmem>>, vector<2x4xf32>
      %cst_11 = arith.constant 3.906250e-03 : f32
      %12 = vector.broadcast %cst_11 : f32 to vector<2x4xf32>
      %13 = arith.mulf %11, %12 : vector<2x4xf32>
      %c0_12 = arith.constant 0 : index
      %c0_13 = arith.constant 0 : index
      %14 = vector.load %arg3[%c0_12, %c0_13] : memref<4x384xf32, #tpu.memory_space<vmem>>, vector<4x384xf32>
      %cst_14 = arith.constant dense<0.000000e+00> : vector<2x384xf32>
      %15 = tpu.matmul %13, %14, %cst_14 {dimension_numbers = #tpu.dot_dimension_numbers<[1], [0], [0], [1], [0, 0, 1, 1], [], []>} : vector<2x4xf32>, vector<4x384xf32>, vector<2x384xf32> -> vector<2x384xf32>
      %c0_15 = arith.constant 0 : index
      %c0_16 = arith.constant 0 : index
      %16 = vector.load %arg4[%c0_15, %c0_16] : memref<1x384xf32, #tpu.memory_space<vmem>>, vector<1x384xf32>
      %17 = vector.broadcast %16 : vector<1x384xf32> to vector<2x384xf32>
      %18 = arith.addf %15, %17 : vector<2x384xf32>
      %c0_17 = arith.constant 0 : index
      %c0_18 = arith.constant 0 : index
      %19 = vector.load %arg5[%c0_17, %c0_18] : memref<384x384xf32, #tpu.memory_space<vmem>>, vector<384x384xf32>
      %cst_19 = arith.constant dense<0.000000e+00> : vector<2x384xf32>
      %20 = tpu.matmul %18, %19, %cst_19 {dimension_numbers = #tpu.dot_dimension_numbers<[1], [0], [0], [1], [0, 0, 1, 1], [], []>} : vector<2x384xf32>, vector<384x384xf32>, vector<2x384xf32> -> vector<2x384xf32>
      %c0_20 = arith.constant 0 : index
      %c0_21 = arith.constant 0 : index
      %21 = vector.load %arg6[%c0_20, %c0_21] : memref<1x384xf32, #tpu.memory_space<vmem>>, vector<1x384xf32>
      %22 = vector.broadcast %21 : vector<1x384xf32> to vector<2x384xf32>
      %23 = arith.addf %20, %22 : vector<2x384xf32>
      %24 = vector.extract_strided_slice %23 {offsets = [0, 0], sizes = [2, 128], strides = [1, 1]} : vector<2x384xf32> to vector<2x128xf32>
      %25 = arith.negf %24 : vector<2x128xf32>
      %26 = math.exp %25 : vector<2x128xf32>
      %cst_22 = arith.constant 1.000000e+00 : f32
      %27 = vector.broadcast %cst_22 : f32 to vector<2x128xf32>
      %28 = arith.addf %27, %26 : vector<2x128xf32>
      %29 = arith.divf %27, %28 : vector<2x128xf32>
      %30 = vector.extract_strided_slice %23 {offsets = [0, 128], sizes = [2, 128], strides = [1, 1]} : vector<2x384xf32> to vector<2x128xf32>
      %31 = vector.extract_strided_slice %23 {offsets = [0, 256], sizes = [2, 128], strides = [1, 1]} : vector<2x384xf32> to vector<2x128xf32>
      %32 = arith.mulf %29, %30 : vector<2x128xf32>
      %33 = arith.addf %32, %31 : vector<2x128xf32>
      %c0_23 = arith.constant 0 : index
      %c0_24 = arith.constant 0 : index
      %34 = vector.load %arg7[%c0_23, %c0_24] : memref<2x128xf32, #tpu.memory_space<vmem>>, vector<2x128xf32>
      tpu.vector_store %arg7[%c0_23, %c0_24], %33 {strides = array<i32>} : memref<2x128xf32, #tpu.memory_space<vmem>>, vector<2x128xf32>,
    } else {
    }
    return
  }
  func.func @transform_0(%arg0: i32, %arg1: i32) -> (i32, i32, i32) {
    %c0_i32 = arith.constant 0 : i32
    %c0_i32_0 = arith.constant 0 : i32
    return %arg0, %arg1, %c0_i32 : i32, i32, i32
  }
  func.func @transform_1(%arg0: i32, %arg1: i32) -> (i32, i32) {
    %c0_i32 = arith.constant 0 : i32
    %c0_i32_0 = arith.constant 0 : i32
    %c0_i32_1 = arith.constant 0 : i32
    return %c0_i32, %c0_i32_0 : i32, i32
  }
  func.func @transform_2(%arg0: i32, %arg1: i32) -> (i32, i32) {
    %c0_i32 = arith.constant 0 : i32
    %c0_i32_0 = arith.constant 0 : i32
    %c0_i32_1 = arith.constant 0 : i32
    return %c0_i32, %c0_i32_0 : i32, i32
  }
  func.func @transform_3(%arg0: i32, %arg1: i32) -> (i32, i32) {
    %c0_i32 = arith.constant 0 : i32
    %c0_i32_0 = arith.constant 0 : i32
    %c0_i32_1 = arith.constant 0 : i32
    return %c0_i32, %c0_i32_0 : i32, i32
  }
  func.func @transform_4(%arg0: i32, %arg1: i32) -> (i32, i32) {
    %c0_i32 = arith.constant 0 : i32
    %c0_i32_0 = arith.constant 0 : i32
    %c0_i32_1 = arith.constant 0 : i32
    return %c0_i32, %c0_i32_0 : i32, i32
  }
  func.func @transform_5(%arg0: i32, %arg1: i32) -> (i32, i32) {
    %c0_i32 = arith.constant 0 : i32
    %c0_i32_0 = arith.constant 0 : i32
    return %arg0, %c0_i32 : i32, i32
  }
}

</mosaic_0001>

<bundles_post_ra>
// kernel: tpu_custom_call.1
= control target key start
LH: loop header
LB: loop body
LE: loop exit
PB: predicated region body
PF: predicated region fallthrough
CT: control target
= control target key end

     0   :  { %10 = vsyncpa [#allocation4], 0  ;;  %s1587_s0 = inlined_call_operand.vmem [shape: f32[2,256,4], index: 0, kind: input, shape index: {}]   ;;  %s1588_s1 = inlined_call_operand.vmem [shape: f32[4,384], index: 1, kind: input, shape index: {}]   ;;  %s1589_s2 = inlined_call_operand.vmem [shape: f32[1,384], index: 2, kind: input, shape index: {}]   ;;  %s1590_s3 = inlined_call_operand.hbm [shape: f32[384,384], index: 3, kind: input, shape index: {}]   ;;  %s1591_s4 = inlined_call_operand.vmem [shape: f32[1,384], index: 4, kind: input, shape index: {}]   ;;  %s1592_s5 = inlined_call_operand.hbm [shape: f32[2,128], index: 5, kind: output, shape index: {}]  }
   0x1   :  { %11 = vsyncpa [#allocation5], 0  ;;  %s1214_s18 = smov [#allocation3]   ;;  %s1166_s22 = scalar_lea.hbm %s1590_s3, 18432 }
   0x2   :  { %s23_s19 = sshll.u32 %s1214_s18, 4  ;;  %p1167_p0 = scmp.ne.s32.totalorder %s1590_s3, %s1166_s22  ;;  %s24_s19 = int_to_ptr.vmem [resolvable:$true] %s23_s19 }
   0x3   :  { %p1170_p1 = scmp.lt.u32.totalorder %s1166_s22, %s1590_s3 }
   0x5   :  { %p1172_p2 = pnand %p1170_p1, %p1167_p0 }
   0x7   :  { %1175 = shalt.err (!%p1172_p2)
}
   0x8   :  { %s1176_s27 = scalar_lea.vmem %s24_s19, 18432  ;;  %p1181_p4 = scmp.lt.s32.totalorder %s24_s19, %s24_s19 }
   0x9   :  { %p1177_p3 = scmp.ne.s32.totalorder %s24_s19, %s1176_s27  ;;  %p1182_p5 = scmp.lt.s32.totalorder %s1176_s27, %s1176_s27 }
   0xb   :  { %p1183_p6 = por %p1182_p5, %p1181_p4 }
   0xd   :  { %p1184_p7 = pnand %p1183_p6, %p1177_p3 }
   0xf   :  { %1187 = shalt.err (!%p1184_p7)
}
  0x10   :  { %s1215_s28 = smov 384   ;;  %s1216_s29 = smov 24  }
  0x11   :  { %29 = dma.hbm_to_vmem [thread:$0]  %s1590_s3, 18432, %s24_s19, [#allocation4], %s1215_s28, %s1215_s28, %s1216_s29  }
  0x12   :  { %1210 = dma.done.wait [#allocation4], 18432  }
  0x13   :  { %1211 = vsyncadd [#allocation4], 4294948864  ;;  %vm39_vm0 = vcmask 25600   ;;  %v1217_v0 = vmov 0.0   ;;  %vm106_vm1 = vcmask 31744   ;;  %v258_v1 = vld [vmem:[%s1588_s1] sm:$0xff] }
  0x14   :  { %40 = vst.msk [vmem:[#allocation2] sm:$0x3] %vm39_vm0, %v1217_v0  ;;  %354 = vmatprep.mubr.f32.mxu1 %v1217_v0  ;;  %vm283_vm2 = vcmask 1043456   ;;  %v41_v2 = vld [vmem:[%s1587_s0] sm:$0xff]  ;;  %v42_v3 = vld [vmem:[%s1587_s0 + $0x8] sm:$0xff]  ;;  %v279_v4 = vcombine.high %v258_v1, %v258_v1  ;;  %v43_v5 = vld [vmem:[%s1587_s0 + $0x10] sm:$0xff] }
  0x15   :  { %v44_v6 = vld [vmem:[%s1587_s0 + $0x18] sm:$0xff]  ;;  %v107_v7 = vsel %vm106_vm1, %v41_v2, 0.0  ;;  %v108_v8 = vsel %vm106_vm1, %v42_v3, 0.0  ;;  %v45_v9 = vld [vmem:[%s1587_s0 + $0x20] sm:$0xff]  ;;  %v110_v11 = vsel %vm106_vm1, %v43_v5, 0.0  ;;  %v46_v13 = vld [vmem:[%s1587_s0 + $0x28] sm:$0xff] }
  0x16   :  { %v109_v10 = vadd.f32 %v108_v8, %v107_v7  ;;  %898 = vmatprep.subr.msk.mxu1 %vm283_vm2, %v279_v4  ;;  %v112_v12 = vsel %vm106_vm1, %v44_v6, 0.0  ;;  %v114_v15 = vsel %vm106_vm1, %v45_v9, 0.0  ;;  %v47_v16 = vld [vmem:[%s1587_s0 + $0x30] sm:$0xff]  ;;  %v116_v18 = vsel %vm106_vm1, %v46_v13, 0.0  ;;  %v48_v19 = vld [vmem:[%s1587_s0 + $0x38] sm:$0xff]  ;;  %v49_v22 = vld [vmem:[%s1587_s0 + $0x40] sm:$0xff] }
  0x17   :  { %899 = vmatpush1.msk.msra.mxu1 %vm283_vm2, %v258_v1  ;;  %v118_v21 = vsel %vm106_vm1, %v47_v16, 0.0  ;;  %v73_v24 = vld [vmem:[%s1587_s0 + $0x100] sm:$0xff]  ;;  %v74_v25 = vld [vmem:[%s1587_s0 + $0x108] sm:$0xff]  ;;  %v75_v26 = vld [vmem:[%s1587_s0 + $0x110] sm:$0xff]  ;;  %v120_v27 = vsel %vm106_vm1, %v48_v19, 0.0  ;;  %v122_v35 = vsel %vm106_vm1, %v49_v22, 0.0 }
  0x18   :  { %v111_v14 = vadd.f32 %v110_v11, %v109_v10  ;;  %958 = vmatprep.subr.mxu1 %v1217_v0  ;;  %v50_v28 = vld [vmem:[%s1587_s0 + $0x48] sm:$0xff]  ;;  %v76_v29 = vld [vmem:[%s1587_s0 + $0x118] sm:$0xff]  ;;  %v176_v31 = vsel %vm106_vm1, %v73_v24, 0.0  ;;  %v177_v32 = vsel %vm106_vm1, %v74_v25, 0.0  ;;  %v179_v33 = vsel %vm106_vm1, %v75_v26, 0.0  ;;  %v77_v34 = vld [vmem:[%s1587_s0 + $0x120] sm:$0xff] }
  0x19   :  { %v178_v36 = vadd.f32 %v177_v32, %v176_v31  ;;  %v51_v37 = vld [vmem:[%s1587_s0 + $0x50] sm:$0xff]  ;;  %v181_v39 = vsel %vm106_vm1, %v76_v29, 0.0  ;;  %v78_v40 = vld [vmem:[%s1587_s0 + $0x128] sm:$0xff]  ;;  %v124_v41 = vsel %vm106_vm1, %v50_v28, 0.0  ;;  %v52_v43 = vld [vmem:[%s1587_s0 + $0x58] sm:$0xff]  ;;  %v183_v45 = vsel %vm106_vm1, %v77_v34, 0.0 }
  0x1a   :  { %v113_v17 = vadd.f32 %v112_v12, %v111_v14  ;;  %v79_v46 = vld [vmem:[%s1587_s0 + $0x130] sm:$0xff]  ;;  %v126_v47 = vsel %vm106_vm1, %v51_v37, 0.0  ;;  %v53_v49 = vld [vmem:[%s1587_s0 + $0x60] sm:$0xff]  ;;  %v185_v51 = vsel %vm106_vm1, %v78_v40, 0.0  ;;  %v80_v52 = vld [vmem:[%s1587_s0 + $0x138] sm:$0xff]  ;;  %v128_v53 = vsel %vm106_vm1, %v52_v43, 0.0 }
  0x1b   :  { %v180_v42 = vadd.f32 %v179_v33, %v178_v36  ;;  %v54_v55 = vld [vmem:[%s1587_s0 + $0x68] sm:$0xff]  ;;  %v187_v57 = vsel %vm106_vm1, %v79_v46, 0.0  ;;  %v55_v58 = vld [vmem:[%s1587_s0 + $0x70] sm:$0xff]  ;;  %v81_v59 = vld [vmem:[%s1587_s0 + $0x140] sm:$0xff]  ;;  %v130_v60 = vsel %vm106_vm1, %v53_v49, 0.0  ;;  %v189_v2 = vsel %vm106_vm1, %v80_v52, 0.0 }
  0x1c   :  { %v115_v20 = vadd.f32 %v114_v15, %v113_v17  ;;  %v56_v62 = vld [vmem:[%s1587_s0 + $0x78] sm:$0xff]  ;;  %v82_v63 = vld [vmem:[%s1587_s0 + $0x148] sm:$0xff]  ;;  %v83_v4 = vld [vmem:[%s1587_s0 + $0x150] sm:$0xff]  ;;  %v132_v5 = vsel %vm106_vm1, %v54_v55, 0.0  ;;  %v191_v11 = vsel %vm106_vm1, %v81_v59, 0.0  ;;  %v134_v17 = vsel %vm106_vm1, %v55_v58, 0.0 }
  0x1d   :  { %v182_v48 = vadd.f32 %v181_v39, %v180_v42  ;;  %v432_v3 = vld [vmem:[#allocation3 + $0x8] sm:$0xff]  ;;  %v435_v7 = vld [vmem:[#allocation3 + $0x20] sm:$0xff]  ;;  %v434_v9 = vld [vmem:[#allocation3 + $0x18] sm:$0xff]  ;;  %v193_v25 = vsel %vm106_vm1, %v82_v63, 0.0  ;;  %v195_v32 = vsel %vm106_vm1, %v83_v4, 0.0  ;;  %vm247_vm3 = vcmask 1041409  }
  0x1e   :  { %v117_v23 = vadd.f32 %v116_v18, %v115_v20  ;;  %v431_v8 = vld [vmem:[#allocation3] sm:$0xff]  ;;  %v998_v12 = vpack.c.bf16 %v435_v7, %v432_v3  ;;  %v438_v14 = vld [vmem:[#allocation3 + $0x38] sm:$0xff]  ;;  %v441_v15 = vld [vmem:[#allocation3 + $0x50] sm:$0xff]  ;;  %vm1218_vm4 = vmmov 0  }
  0x1f   :  { %v184_v54 = vadd.f32 %v183_v45, %v182_v48  ;;  %v1000_v13 = vpack.c.bf16 %v434_v9, %v431_v8  ;;  %v437_v16 = vld [vmem:[#allocation3 + $0x30] sm:$0xff]  ;;  %v1002_v19 = vpack.c.bf16 %v441_v15, %v438_v14  ;;  %v440_v20 = vld [vmem:[#allocation3 + $0x48] sm:$0xff]  ;;  %v447_v22 = vld [vmem:[#allocation3 + $0x80] sm:$0xff] }
  0x20   :  { %v119_v30 = vadd.f32 %v118_v21, %v117_v23  ;;  %v444_v21 = vld [vmem:[#allocation3 + $0x68] sm:$0xff]  ;;  %v57_v23 = vld [vmem:[%s1587_s0 + $0x80] sm:$0xff]  ;;  %999 = vmatprep.subr.bf16.mxu0 %v998_v12  ;;  %v84_v26 = vld [vmem:[%s1587_s0 + $0x158] sm:$0xff]  ;;  %v1004_v29 = vpack.c.bf16 %v440_v20, %v437_v16 }
  0x21   :  { %v186_v61 = vadd.f32 %v185_v51, %v184_v54  ;;  %1001 = vmatpush1.bf16.msra.mxu0 %v1000_v13  ;;  %v1006_v33 = vpack.c.bf16 %v447_v22, %v444_v21  ;;  %v443_v34 = vld [vmem:[#allocation3 + $0x60] sm:$0xff]  ;;  %v138_v37 = vsel %vm106_vm1, %v57_v23, 0.0  ;;  %v450_v39 = vld [vmem:[#allocation3 + $0x98] sm:$0xff]  ;;  %v453_v40 = vld [vmem:[#allocation3 + $0xb0] sm:$0xff]  ;;  %v197_v43 = vsel %vm106_vm1, %v84_v26, 0.0 }
  0x22   :  { %v121_v38 = vadd.f32 %v120_v27, %v119_v30  ;;  %v136_v27 = vsel %vm106_vm1, %v56_v62, 0.0  ;;  %v58_v30 = vld [vmem:[%s1587_s0 + $0x88] sm:$0xff]  ;;  %1003 = vmatprep.subr.bf16.mxu0 %v1002_v19  ;;  %v85_v36 = vld [vmem:[%s1587_s0 + $0x160] sm:$0xff]  ;;  %v60_v48 = vld [vmem:[%s1587_s0 + $0x98] sm:$0xff]  ;;  %v1010_v51 = vpack.c.bf16 %v453_v40, %v450_v39 }
  0x23   :  { %v188_v6 = vadd.f32 %v187_v57, %v186_v61  ;;  %v140_v45 = vsel %vm106_vm1, %v58_v30, 0.0  ;;  %v449_v52 = vld [vmem:[#allocation3 + $0x90] sm:$0xff]  ;;  %v456_v57 = vld [vmem:[#allocation3 + $0xc8] sm:$0xff]  ;;  %v459_v58 = vld [vmem:[#allocation3 + $0xe0] sm:$0xff]  ;;  %v144_v63 = vsel %vm106_vm1, %v60_v48, 0.0 }
  0x24   :  { %v123_v44 = vadd.f32 %v122_v35, %v121_v38  ;;  %v446_v35 = vld [vmem:[#allocation3 + $0x78] sm:$0xff]  ;;  %v87_v54 = vld [vmem:[%s1587_s0 + $0x170] sm:$0xff]  ;;  %v62_v3 = vld [vmem:[%s1587_s0 + $0xa8] sm:$0xff] }
  0x25   :  { %v190_v18 = vadd.f32 %v189_v2, %v188_v6  ;;  %1005 = vmatpush1.bf16.msra.mxu0 %v1004_v29  ;;  %v61_v59 = vld [vmem:[%s1587_s0 + $0xa0] sm:$0xff]  ;;  %v88_v62 = vld [vmem:[%s1587_s0 + $0x178] sm:$0xff]  ;;  %v1014_v6 = vpack.c.bf16 %v459_v58, %v456_v57  ;;  %v63_v14 = vld [vmem:[%s1587_s0 + $0xb0] sm:$0xff] }
  0x26   :  { %v125_v50 = vadd.f32 %v124_v41, %v123_v44  ;;  %v59_v41 = vld [vmem:[%s1587_s0 + $0x90] sm:$0xff]  ;;  %v86_v44 = vld [vmem:[%s1587_s0 + $0x168] sm:$0xff]  ;;  %1007 = vmatprep.subr.bf16.mxu0 %v1006_v33  ;;  %v458_v8 = vld [vmem:[#allocation3 + $0xd8] sm:$0xff]  ;;  %v205_v16 = vsel %vm106_vm1, %v88_v62, 0.0 }
  0x27   :  { %v192_v28 = vadd.f32 %v191_v11, %v190_v18  ;;  %v142_v55 = vsel %vm106_vm1, %v59_v41, 0.0  ;;  %v201_v61 = vsel %vm106_vm1, %v86_v44, 0.0  ;;  %v455_v7 = vld [vmem:[#allocation3 + $0xc0] sm:$0xff]  ;;  %v462_v12 = vld [vmem:[#allocation3 + $0xf8] sm:$0xff]  ;;  %v465_v13 = vld [vmem:[#allocation3 + $0x110] sm:$0xff]  ;;  %v148_v18 = vsel %vm106_vm1, %v62_v3, 0.0 }
  0x28   :  { %v127_v56 = vadd.f32 %v126_v47, %v125_v50  ;;  %v1008_v47 = vpack.c.bf16 %v446_v35, %v443_v34  ;;  %v199_v50 = vsel %vm106_vm1, %v85_v36, 0.0  ;;  %v89_v9 = vld [vmem:[%s1587_s0 + $0x180] sm:$0xff]  ;;  %v1016_v20 = vpack.c.bf16 %v458_v8, %v455_v7  ;;  %v64_v21 = vld [vmem:[%s1587_s0 + $0xb8] sm:$0xff]  ;;  %v464_v26 = vld [vmem:[#allocation3 + $0x108] sm:$0xff] }
  0x29   :  { %v194_v38 = vadd.f32 %v193_v25, %v192_v28  ;;  %v207_v23 = vsel %vm106_vm1, %v89_v9, 0.0  ;;  %v461_v25 = vld [vmem:[#allocation3 + $0xf0] sm:$0xff]  ;;  %v150_v28 = vsel %vm106_vm1, %v63_v14, 0.0  ;;  %v468_v30 = vld [vmem:[#allocation3 + $0x128] sm:$0xff]  ;;  %v152_v36 = vsel %vm106_vm1, %v64_v21, 0.0  ;;  %v470_v44 = vld [vmem:[#allocation3 + $0x138] sm:$0xff] }
  0x2a   :  { %v129_v1 = vadd.f32 %v128_v53, %v127_v56  ;;  %v452_v53 = vld [vmem:[#allocation3 + $0xa8] sm:$0xff]  ;;  %1009 = vmatpush1.bf16.msra.mxu0 %v1008_v47  ;;  %v92_v35 = vld [vmem:[%s1587_s0 + $0x198] sm:$0xff] }
  0x2b   :  { %v196_v46 = vadd.f32 %v195_v32, %v194_v38  ;;  %v1012_v2 = vpack.c.bf16 %v452_v53, %v449_v52  ;;  %1011 = vmatprep.subr.bf16.mxu0 %v1010_v51  ;;  %v65_v32 = vld [vmem:[%s1587_s0 + $0xc0] sm:$0xff]  ;;  %v1020_v38 = vpack.c.bf16 %v464_v26, %v461_v25  ;;  %v66_v39 = vld [vmem:[%s1587_s0 + $0xc8] sm:$0xff]  ;;  %v213_v52 = vsel %vm106_vm1, %v92_v35, 0.0  ;;  %v68_v57 = vld [vmem:[%s1587_s0 + $0xd8] sm:$0xff] }
  0x2c   :  { %v131_v10 = vadd.f32 %v130_v60, %v129_v1  ;;  %v474_v48 = vld [vmem:[#allocation3 + $0x158] sm:$0xff]  ;;  %v94_v53 = vld [vmem:[%s1587_s0 + $0x1a8] sm:$0xff]  ;;  %v160_v9 = vsel %vm106_vm1, %v68_v57, 0.0 }
  0x2d   :  { %v198_v56 = vadd.f32 %v197_v43, %v196_v46  ;;  %v467_v43 = vld [vmem:[#allocation3 + $0x120] sm:$0xff]  ;;  %v154_v46 = vsel %vm106_vm1, %v65_v32, 0.0  ;;  %v476_v62 = vld [vmem:[#allocation3 + $0x168] sm:$0xff]  ;;  %v217_v7 = vsel %vm106_vm1, %v94_v53, 0.0  ;;  %v96_v8 = vld [vmem:[%s1587_s0 + $0x1b8] sm:$0xff] }
  0x2e   :  { %v133_v24 = vadd.f32 %v132_v5, %v131_v10  ;;  %v203_v5 = vsel %vm106_vm1, %v87_v54, 0.0  ;;  %v146_v10 = vsel %vm106_vm1, %v61_v59, 0.0  ;;  %1013 = vmatpush1.bf16.msra.mxu0 %v1012_v2  ;;  %v156_v54 = vsel %vm106_vm1, %v66_v39, 0.0  ;;  %v480_v3 = vld [vmem:[#allocation3 + $0x188] sm:$0xff]  ;;  %v486_v21 = vld [vmem:[#allocation3 + $0x1b8] sm:$0xff] }
  0x2f   :  { %v200_v1 = vadd.f32 %v199_v50, %v198_v56  ;;  %1015 = vmatprep.subr.bf16.mxu0 %v1014_v6  ;;  %v67_v50 = vld [vmem:[%s1587_s0 + $0xd0] sm:$0xff]  ;;  %v1024_v56 = vpack.c.bf16 %v470_v44, %v467_v43  ;;  %v221_v25 = vsel %vm106_vm1, %v96_v8, 0.0  ;;  %v98_v26 = vld [vmem:[%s1587_s0 + $0x1c8] sm:$0xff]  ;;  %v100_v43 = vld [vmem:[%s1587_s0 + $0x1d8] sm:$0xff] }
  0x30   :  { %v135_v31 = vadd.f32 %v134_v17, %v133_v24  ;;  %v90_v17 = vld [vmem:[%s1587_s0 + $0x188] sm:$0xff]  ;;  %v1018_v24 = vpack.c.bf16 %v465_v13, %v462_v12  ;;  %v229_v57 = vsel %vm106_vm1, %v100_v43, 0.0  ;;  %v104_v8 = vld [vmem:[%s1587_s0 + $0x1f8] sm:$0xff] }
  0x31   :  { %v202_v11 = vadd.f32 %v201_v61, %v200_v1  ;;  %v209_v34 = vsel %vm106_vm1, %v90_v17, 0.0  ;;  %v473_v61 = vld [vmem:[#allocation3 + $0x150] sm:$0xff]  ;;  %v158_v1 = vsel %vm106_vm1, %v67_v50, 0.0  ;;  %v70_v12 = vld [vmem:[%s1587_s0 + $0xe8] sm:$0xff]  ;;  %v482_v17 = vld [vmem:[#allocation3 + $0x198] sm:$0xff] }
  0x32   :  { %v137_v42 = vadd.f32 %v136_v27, %v135_v31  ;;  %v91_v27 = vld [vmem:[%s1587_s0 + $0x190] sm:$0xff]  ;;  %v471_v31 = vld [vmem:[#allocation3 + $0x140] sm:$0xff]  ;;  %1017 = vmatpush1.bf16.msra.mxu0 %v1016_v20 }
  0x33   :  { %v204_v19 = vadd.f32 %v203_v5, %v202_v11  ;;  %v211_v41 = vsel %vm106_vm1, %v91_v27, 0.0  ;;  %1019 = vmatprep.subr.bf16.mxu0 %v1018_v24  ;;  %v69_v5 = vld [vmem:[%s1587_s0 + $0xe0] sm:$0xff]  ;;  %v1028_v11 = vpack.c.bf16 %v476_v62, %v473_v61  ;;  %v164_v27 = vsel %vm106_vm1, %v70_v12, 0.0  ;;  %v488_v35 = vld [vmem:[#allocation3 + $0x1c8] sm:$0xff] }
  0x34   :  { %v139_v49 = vadd.f32 %v138_v37, %v137_v42  ;;  %v1022_v42 = vpack.c.bf16 %v471_v31, %v468_v30  ;;  %v72_v30 = vld [vmem:[%s1587_s0 + $0xf8] sm:$0xff]  ;;  %v492_v39 = vld [vmem:[#allocation3 + $0x1e8] sm:$0xff]  ;;  %v491_v50 = vld [vmem:[#allocation3 + $0x1e0] sm:$0xff] }
  0x35   :  { %v206_v29 = vadd.f32 %v205_v16, %v204_v19  ;;  %v479_v16 = vld [vmem:[#allocation3 + $0x180] sm:$0xff]  ;;  %v162_v19 = vsel %vm106_vm1, %v69_v5, 0.0  ;;  %v168_v44 = vsel %vm106_vm1, %v72_v30, 0.0  ;;  %v504_v5 = vld [vmem:[#allocation3 + $0x248] sm:$0xff] }
  0x36   :  { %v141_v60 = vadd.f32 %v140_v45, %v139_v49  ;;  %v93_v45 = vld [vmem:[%s1587_s0 + $0x1a0] sm:$0xff]  ;;  %v477_v49 = vld [vmem:[#allocation3 + $0x170] sm:$0xff]  ;;  %1021 = vmatpush1.bf16.msra.mxu0 %v1020_v38 }
  0x37   :  { %v208_v37 = vadd.f32 %v207_v23, %v206_v29  ;;  %v215_v59 = vsel %vm106_vm1, %v93_v45, 0.0  ;;  %1023 = vmatprep.subr.bf16.mxu0 %v1022_v42  ;;  %v71_v23 = vld [vmem:[%s1587_s0 + $0xf0] sm:$0xff]  ;;  %v1032_v29 = vpack.c.bf16 %v482_v17, %v479_v16  ;;  %v225_v42 = vsel %vm106_vm1, %v98_v26, 0.0  ;;  %v510_v17 = vld [vmem:[#allocation3 + $0x278] sm:$0xff] }
  0x38   :  { %v143_v4 = vadd.f32 %v142_v55, %v141_v60  ;;  %v1026_v60 = vpack.c.bf16 %v477_v49, %v474_v48 }
  0x39   :  { %v210_v47 = vadd.f32 %v209_v34, %v208_v37  ;;  %v485_v34 = vld [vmem:[#allocation3 + $0x1b0] sm:$0xff]  ;;  %v166_v37 = vsel %vm106_vm1, %v71_v23, 0.0 }
  0x3a   :  { %v145_v15 = vadd.f32 %v144_v63, %v143_v4  ;;  %v95_v63 = vld [vmem:[%s1587_s0 + $0x1b0] sm:$0xff]  ;;  %v483_v4 = vld [vmem:[#allocation3 + $0x1a0] sm:$0xff]  ;;  %1025 = vmatpush1.bf16.msra.mxu0 %v1024_v56 }
  0x3b   :  { %v212_v55 = vadd.f32 %v211_v41, %v210_v47  ;;  %v219_v14 = vsel %vm106_vm1, %v95_v63, 0.0  ;;  %1027 = vmatprep.subr.bf16.mxu0 %v1026_v60 }
  0x3c   :  { %v147_v22 = vadd.f32 %v146_v10, %v145_v15  ;;  %v1030_v15 = vpack.c.bf16 %v483_v4, %v480_v3  ;;  %v103_v3 = vld [vmem:[%s1587_s0 + $0x1f0] sm:$0xff] }
  0x3d   :  { %v214_v2 = vadd.f32 %v213_v52, %v212_v55  ;;  %v101_v52 = vld [vmem:[%s1587_s0 + $0x1e0] sm:$0xff]  ;;  %v501_v55 = vld [vmem:[#allocation3 + $0x230] sm:$0xff]  ;;  %v235_v12 = vsel %vm106_vm1, %v103_v3, 0.0 }
  0x3e   :  { %v149_v33 = vadd.f32 %v148_v18, %v147_v22  ;;  %v97_v18 = vld [vmem:[%s1587_s0 + $0x1c0] sm:$0xff]  ;;  %v489_v22 = vld [vmem:[#allocation3 + $0x1d0] sm:$0xff]  ;;  %1029 = vmatpush1.bf16.msra.mxu0 %v1028_v11  ;;  %v231_v62 = vsel %vm106_vm1, %v101_v52, 0.0 }
  0x3f   :  { %v216_v10 = vadd.f32 %v215_v59, %v214_v2  ;;  %v223_v32 = vsel %vm106_vm1, %v97_v18, 0.0  ;;  %1031 = vmatprep.subr.bf16.mxu0 %v1030_v15  ;;  %v500_v2 = vld [vmem:[#allocation3 + $0x228] sm:$0xff]  ;;  %v506_v15 = vld [vmem:[#allocation3 + $0x258] sm:$0xff]  ;;  %v513_v18 = vld [vmem:[#allocation3 + $0x290] sm:$0xff] }
  0x40   :  { %v151_v40 = vadd.f32 %v150_v28, %v149_v33  ;;  %v1034_v33 = vpack.c.bf16 %v489_v22, %v486_v21  ;;  %v1050_v23 = vpack.c.bf16 %v513_v18, %v510_v17  ;;  %v433_v52 = vld [vmem:[#allocation3 + $0x10] sm:$0xff]  ;;  %v499_v3 = vld [vmem:[#allocation3 + $0x220] sm:$0xff] }
  0x41   :  { %v218_v20 = vadd.f32 %v217_v7, %v216_v10 }
  0x42   :  { %v153_v51 = vadd.f32 %v152_v36, %v151_v40  ;;  %v99_v36 = vld [vmem:[%s1587_s0 + $0x1d0] sm:$0xff]  ;;  %v495_v40 = vld [vmem:[#allocation3 + $0x200] sm:$0xff]  ;;  %1033 = vmatpush1.bf16.msra.mxu0 %v1032_v29 }
  0x43   :  { %v220_v28 = vadd.f32 %v219_v14, %v218_v20  ;;  %v227_v48 = vsel %vm106_vm1, %v99_v36, 0.0  ;;  %1035 = vmatprep.subr.bf16.mxu0 %v1034_v33  ;;  %v1038_v49 = vpack.c.bf16 %v495_v40, %v492_v39  ;;  %v503_v14 = vld [vmem:[#allocation3 + $0x240] sm:$0xff] }
  0x44   :  { %v155_v58 = vadd.f32 %v154_v46, %v153_v51  ;;  %v1036_v46 = vpack.c.bf16 %v488_v35, %v485_v34  ;;  %v494_v51 = vld [vmem:[#allocation3 + $0x1f8] sm:$0xff]  ;;  %v1048_v22 = vpack.c.bf16 %v506_v15, %v503_v14  ;;  %v515_v33 = vld [vmem:[#allocation3 + $0x2a0] sm:$0xff]  ;;  %v460_v14 = vld [vmem:[#allocation3 + $0xe8] sm:$0xff] }
  0x45   :  { %v222_v38 = vadd.f32 %v221_v25, %v220_v28  ;;  %v1040_v60 = vpack.c.bf16 %v494_v51, %v491_v50  ;;  %v512_v25 = vld [vmem:[#allocation3 + $0x288] sm:$0xff]  ;;  %v519_v28 = vld [vmem:[#allocation3 + $0x2c0] sm:$0xff]  ;;  %v518_v34 = vld [vmem:[#allocation3 + $0x2b8] sm:$0xff] }
  0x46   :  { %v157_v6 = vadd.f32 %v156_v54, %v155_v58  ;;  %v498_v54 = vld [vmem:[#allocation3 + $0x218] sm:$0xff]  ;;  %v102_v58 = vld [vmem:[%s1587_s0 + $0x1e8] sm:$0xff]  ;;  %1037 = vmatpush1.bf16.msra.mxu0 %v1036_v46  ;;  %v481_v46 = vld [vmem:[#allocation3 + $0x190] sm:$0xff] }
  0x47   :  { %v224_v45 = vadd.f32 %v223_v32, %v222_v38  ;;  %1039 = vmatprep.subr.bf16.mxu0 %v1038_v49  ;;  %v1042_v63 = vpack.c.bf16 %v501_v55, %v498_v54  ;;  %v233_v7 = vsel %vm106_vm1, %v102_v58, 0.0  ;;  %v1056_v38 = vpack.c.bf16 %v518_v34, %v515_v33  ;;  %v259_v50 = vld [vmem:[%s1588_s1 + $0x8] sm:$0xf]  ;;  %v490_v55 = vld [vmem:[#allocation3 + $0x1d8] sm:$0xff]  ;;  %v521_v33 = vld [vmem:[#allocation3 + $0x2d0] sm:$0xff] }
  0x48   :  { %v159_v13 = vadd.f32 %v158_v1, %v157_v6  ;;  %v497_v1 = vld [vmem:[#allocation3 + $0x210] sm:$0xff]  ;;  %v507_v6 = vld [vmem:[#allocation3 + $0x260] sm:$0xff]  ;;  %v524_v34 = vld [vmem:[#allocation3 + $0x2e8] sm:$0xff] }
  0x49   :  { %v226_v53 = vadd.f32 %v225_v42, %v224_v45  ;;  %v1044_v11 = vpack.c.bf16 %v500_v2, %v497_v1  ;;  %v105_v42 = vld [vmem:[#allocation2] sm:$0x3]  ;;  %v487_v54 = vld [vmem:[#allocation3 + $0x1c0] sm:$0xff]  ;;  %v445_v1 = vld [vmem:[#allocation3 + $0x70] sm:$0xff] }
  0x4a   :  { %v161_v24 = vadd.f32 %v160_v9, %v159_v13  ;;  %1041 = vmatpush1.bf16.msra.mxu0 %v1040_v60  ;;  %v1046_v13 = vpack.c.bf16 %v507_v6, %v504_v5  ;;  %v439_v58 = vld [vmem:[#allocation3 + $0x40] sm:$0xff]  ;;  %v493_v60 = vld [vmem:[#allocation3 + $0x1f0] sm:$0xff]  ;;  %v448_v2 = vld [vmem:[#allocation3 + $0x88] sm:$0xff] }
  0x4b   :  { %v228_v59 = vadd.f32 %v227_v48, %v226_v53  ;;  %1043 = vmatprep.subr.bf16.mxu0 %v1042_v63  ;;  %v436_v53 = vld [vmem:[#allocation3 + $0x28] sm:$0xff]  ;;  %v1104_v5 = vpack.c.bf16 %v448_v2, %v445_v1  ;;  %v511_v15 = vld [vmem:[#allocation3 + $0x280] sm:$0xff] }
  0x4c   :  { %v163_v31 = vadd.f32 %v162_v19, %v161_v24  ;;  %v237_v19 = vsel %vm106_vm1, %v104_v8, 0.0  ;;  %v509_v24 = vld [vmem:[#allocation3 + $0x270] sm:$0xff]  ;;  %v454_v8 = vld [vmem:[#allocation3 + $0xb8] sm:$0xff]  ;;  %v536_v2 = vld [vmem:[#allocation3 + $0x348] sm:$0xff] }
  0x4d   :  { %v230_v4 = vadd.f32 %v229_v57, %v228_v59  ;;  %v1098_v57 = vpack.c.bf16 %v490_v55, %v487_v54  ;;  %v442_v59 = vld [vmem:[#allocation3 + $0x58] sm:$0xff]  ;;  %v532_v54 = vld [vmem:[#allocation3 + $0x328] sm:$0xff] }
  0x4e   :  { %v165_v41 = vadd.f32 %v164_v27, %v163_v31  ;;  %1045 = vmatpush1.bf16.msra.mxu0 %v1044_v11  ;;  %v516_v27 = vld [vmem:[#allocation3 + $0x2a8] sm:$0xff]  ;;  %v1052_v31 = vpack.c.bf16 %v512_v25, %v509_v24  ;;  %v469_v25 = vld [vmem:[#allocation3 + $0x130] sm:$0xff] }
  0x4f   :  { %v232_v10 = vadd.f32 %v231_v62, %v230_v4  ;;  %1047 = vmatprep.subr.bf16.mxu0 %v1046_v13  ;;  %v1054_v32 = vpack.c.bf16 %v519_v28, %v516_v27  ;;  %v1100_v62 = vpack.c.bf16 %v442_v59, %v439_v58  ;;  %v502_v4 = vld [vmem:[#allocation3 + $0x238] sm:$0xff]  ;;  %v457_v13 = vld [vmem:[#allocation3 + $0xd0] sm:$0xff] }
  0x50   :  { %v167_v47 = vadd.f32 %v166_v37, %v165_v41  ;;  %v1106_v6 = vpack.c.bf16 %v502_v4, %v499_v3  ;;  %v1112_v17 = vpack.c.bf16 %v460_v14, %v457_v13  ;;  %v522_v28 = vld [vmem:[#allocation3 + $0x2d8] sm:$0xff]  ;;  %v535_v3 = vld [vmem:[#allocation3 + $0x340] sm:$0xff]  ;;  %v541_v14 = vld [vmem:[#allocation3 + $0x370] sm:$0xff] }
  0x51   :  { %v234_v16 = vadd.f32 %v233_v7, %v232_v10  ;;  %v451_v7 = vld [vmem:[#allocation3 + $0xa0] sm:$0xff]  ;;  %v508_v10 = vld [vmem:[#allocation3 + $0x268] sm:$0xff]  ;;  %v538_v4 = vld [vmem:[#allocation3 + $0x358] sm:$0xff] }
  0x52   :  { %v169_v56 = vadd.f32 %v168_v44, %v167_v47  ;;  %1049 = vmatpush1.bf16.msra.mxu0 %v1048_v22  ;;  %v484_v47 = vld [vmem:[#allocation3 + $0x1a8] sm:$0xff]  ;;  %v1108_v11 = vpack.c.bf16 %v454_v8, %v451_v7  ;;  %v542_v13 = vld [vmem:[#allocation3 + $0x378] sm:$0xff] }
  0x53   :  { %v236_v21 = vadd.f32 %v235_v12, %v234_v16  ;;  %1051 = vmatprep.subr.bf16.mxu0 %v1050_v23  ;;  %v1094_v51 = vpack.c.bf16 %v484_v47, %v481_v46  ;;  %v514_v16 = vld [vmem:[#allocation3 + $0x298] sm:$0xff]  ;;  %v520_v22 = vld [vmem:[#allocation3 + $0x2c8] sm:$0xff] }
  0x54   :  { %v170_v61 = vrot.slane %v169_v56, 4  ;;  %v1114_v18 = vpack.c.bf16 %v514_v16, %v511_v15  ;;  %v1544_v47 = vld [vmem:[%s1589_s2] sm:$0x7]  ;;  %v544_v15 = vld [vmem:[#allocation3 + $0x388] sm:$0xff] }
  0x55   :  { %v238_v26 = vadd.f32 %v237_v19, %v236_v21  ;;  %v463_v19 = vld [vmem:[#allocation3 + $0x100] sm:$0xff]  ;;  %v517_v21 = vld [vmem:[#allocation3 + $0x2b0] sm:$0xff]  ;;  %v546_v16 = vld [vmem:[#allocation3 + $0x398] sm:$0xff] }
  0x56   :  { %v171_v9 = vadd.f32 %v170_v61, %v169_v56  ;;  %1053 = vmatpush1.bf16.msra.mxu0 %v1052_v31  ;;  %v1096_v56 = vpack.c.bf16 %v436_v53, %v433_v52  ;;  %v496_v61 = vld [vmem:[#allocation3 + $0x208] sm:$0xff]  ;;  %v1118_v24 = vpack.c.bf16 %v520_v22, %v517_v21  ;;  %v530_v52 = vld [vmem:[#allocation3 + $0x318] sm:$0xff]  ;;  %v529_v53 = vld [vmem:[#allocation3 + $0x310] sm:$0xff] }
  0x57   :  { %v239_v30 = vrot.slane %v238_v26, 4  ;;  %1055 = vmatprep.subr.bf16.mxu0 %v1054_v32  ;;  %v1102_v63 = vpack.c.bf16 %v496_v61, %v493_v60  ;;  %v526_v32 = vld [vmem:[#allocation3 + $0x2f8] sm:$0xff]  ;;  %v1127_v61 = vpack.c.bf16 %v532_v54, %v529_v53  ;;  %v548_v22 = vld [vmem:[#allocation3 + $0x3a8] sm:$0xff]  ;;  %v565_v54 = vld [vmem:[#allocation3 + $0x430] sm:$0xff] }
  0x58   :  { %v172_v20 = vrot.slane %v171_v9, 2  ;;  %v566_v53 = vld [vmem:[#allocation3 + $0x438] sm:$0xff] }
  0x59   :  { %v240_v35 = vadd.f32 %v239_v30, %v238_v26  ;;  %v472_v26 = vld [vmem:[#allocation3 + $0x148] sm:$0xff]  ;;  %v523_v30 = vld [vmem:[#allocation3 + $0x2e0] sm:$0xff] }
  0x5a   :  { %v173_v29 = vadd.f32 %v172_v20, %v171_v9  ;;  %1057 = vmatpush1.bf16.msra.mxu0 %v1056_v38  ;;  %v505_v9 = vld [vmem:[#allocation3 + $0x250] sm:$0xff]  ;;  %v466_v20 = vld [vmem:[#allocation3 + $0x118] sm:$0xff]  ;;  %v1120_v27 = vpack.c.bf16 %v472_v26, %v469_v25  ;;  %v552_v25 = vld [vmem:[#allocation3 + $0x3c8] sm:$0xff] }
  0x5b   :  { %v241_v37 = vrot.slane %v240_v35, 2  ;;  %v1110_v12 = vpack.c.bf16 %v508_v10, %v505_v9  ;;  %v1116_v23 = vpack.c.bf16 %v466_v20, %v463_v19  ;;  %v478_v38 = vld [vmem:[#allocation3 + $0x178] sm:$0xff]  ;;  %v1130_v10 = vpack.c.bf16 %v538_v4, %v535_v3  ;;  %v545_v20 = vld [vmem:[#allocation3 + $0x390] sm:$0xff]  ;;  %v555_v26 = vld [vmem:[#allocation3 + $0x3e0] sm:$0xff] }
  0x5c   :  { %v174_v36 = vrot.slane %v173_v29, 1  ;;  %v1133_v19 = vpack.c.bf16 %v544_v15, %v541_v14 }
  0x5d   :  { %v242_v39 = vadd.f32 %v241_v37, %v240_v35  ;;  %v1122_v35 = vpack.c.bf16 %v526_v32, %v523_v30  ;;  %v475_v37 = vld [vmem:[#allocation3 + $0x160] sm:$0xff]  ;;  %v554_v30 = vld [vmem:[#allocation3 + $0x3d8] sm:$0xff]  ;;  %v556_v32 = vld [vmem:[#allocation3 + $0x3e8] sm:$0xff] }
  0x5e   :  { %v175_v40 = vadd.f32 %v174_v36, %v173_v29  ;;  %v525_v29 = vld [vmem:[#allocation3 + $0x2f0] sm:$0xff]  ;;  %v1060_v36 = vpack.c.bf16 %v524_v34, %v521_v33  ;;  %v558_v33 = vld [vmem:[#allocation3 + $0x3f8] sm:$0xff] }
  0x5f   :  { %v243_v41 = vrot.slane %v242_v39, 1  ;;  %v1058_v31 = vpack.c.bf16 %v525_v29, %v522_v28  ;;  %v551_v29 = vld [vmem:[#allocation3 + $0x3c0] sm:$0xff]  ;;  %v561_v34 = vld [vmem:[#allocation3 + $0x410] sm:$0xff] }
  0x61   :  { %v244_v43 = vadd.f32 %v243_v41, %v242_v39  ;;  %1059 = vmatprep.subr.bf16.mxu0 %v1058_v31  ;;  %v1124_v39 = vpack.c.bf16 %v478_v38, %v475_v37  ;;  %v531_v41 = vld [vmem:[#allocation3 + $0x320] sm:$0xff]  ;;  %v553_v31 = vld [vmem:[#allocation3 + $0x3d0] sm:$0xff]  ;;  %v1082_v38 = vpack.c.bf16 %v561_v34, %v558_v33 }
  0x62   :  { %1061 = vmatpush1.bf16.msra.mxu0 %v1060_v36  ;;  %v1139_v36 = vpack.c.bf16 %v556_v32, %v553_v31  ;;  %v557_v37 = vld [vmem:[#allocation3 + $0x3f0] sm:$0xff] }
  0x63   :  { %v248_v44 = vsel %vm247_vm3, %v244_v43, %v175_v40  ;;  %v528_v40 = vld [vmem:[#allocation3 + $0x308] sm:$0xff]  ;;  %v1219_v43 = vmov 0.0|0.0  }
  0x64   :  { %v250_v45 = vadd.f32 %v248_v44, %v105_v42  ;;  %v1062_v42 = vpack.c.bf16 %v531_v41, %v528_v40  ;;  %v262_v44 = vlaneseq  ;;  %v559_v40 = vld [vmem:[#allocation3 + $0x400] sm:$0xff]  ;;  %v562_v41 = vld [vmem:[#allocation3 + $0x418] sm:$0xff] }
  0x66   :  { %252 = vst.msk [vmem:[#allocation2] sm:$0x3] %vm39_vm0, %v250_v45  ;;  %1063 = vmatprep.subr.bf16.mxu0 %v1062_v42  ;;  %v1538_v45 = vshrl.u32 %v262_v44, 7  ;;  %v564_v42 = vld [vmem:[#allocation3 + $0x428] sm:$0xff]  ;;  %v567_v44 = vld [vmem:[#allocation3 + $0x440] sm:$0xff] }
  0x68   :  { %v268_v46 = vsub.s32 1, %v1538_v45 }
  0x6d   :  { %v256_v48 = vld [vmem:[#allocation2] sm:$0x3] }
  0x6e   :  { %v257_v49 = vmul.f32 0.00390625, %v256_v48  ;;  %v264_v48 = vsub.s32 0, %v1538_v45 }
  0x70   :  { %900 = vmatmul.mubr.msk.f32.vlgmr.msra.gmra.mrb[0].mxu1 %vm106_vm1, %v257_v49 }
  0x71   :  { %959 = vmatpush3.msk.msra.mxu1 %vm283_vm2, %v259_v50  ;;  %960 = vmatprep.mubr.msk.f32.mxu1 %vm1218_vm4, %v1217_v0  ;;  %v527_v50 = vld [vmem:[#allocation3 + $0x300] sm:$0xff] }
  0x72   :  { %1095 = vmatprep.subr.bf16.mxu1 %v1094_v51  ;;  %v265_v51 = vrot.slane %v1544_v47, %v264_v48  ;;  %v1064_v60 = vpack.c.bf16 %v530_v52, %v527_v50  ;;  %v1142_v50 = vpack.c.bf16 %v562_v41, %v559_v40  ;;  %v1086_v52 = vpack.c.bf16 %v567_v44, %v564_v42 }
  0x74   :  { %961 = vmatmul.mubr.msk.f32.vlgmr.msra.gmra.mrb[2].mxu1 %vm106_vm1, %v257_v49  ;;  %v269_v49 = vrot.slane %v1544_v47, %v268_v46 }
  0x75   :  { %1097 = vmatpush3.bf16.msra.mxu1 %v1096_v56  ;;  %v534_v56 = vld [vmem:[#allocation3 + $0x338] sm:$0xff] }
  0x76   :  { %1099 = vmatprep.subr.bf16.mxu1 %v1098_v57  ;;  %v537_v57 = vld [vmem:[#allocation3 + $0x350] sm:$0xff] }
  0x77   :  { %v1066_v1 = vpack.c.bf16 %v537_v57, %v534_v56  ;;  %v570_v56 = vld [vmem:[#allocation3 + $0x458] sm:$0xff]  ;;  %v573_v57 = vld [vmem:[#allocation3 + $0x470] sm:$0xff] }
  0x79   :  { %1101 = vmatpush3.bf16.msra.mxu1 %v1100_v62  ;;  %v533_v62 = vld [vmem:[#allocation3 + $0x330] sm:$0xff] }
  0x7a   :  { %1103 = vmatprep.subr.bf16.mxu1 %v1102_v63  ;;  %v1068_v9 = vpack.c.bf16 %v536_v2, %v533_v62  ;;  %v1090_v62 = vpack.c.bf16 %v573_v57, %v570_v56  ;;  %v574_v2 = vld [vmem:[#allocation3 + $0x478] sm:$0xff] }
  0x7d   :  { %1105 = vmatpush3.bf16.msra.mxu1 %v1104_v5  ;;  %v540_v5 = vld [vmem:[#allocation3 + $0x368] sm:$0xff] }
  0x7e   :  { %1107 = vmatprep.subr.bf16.mxu1 %v1106_v6  ;;  %v543_v6 = vld [vmem:[#allocation3 + $0x380] sm:$0xff] }
  0x81   :  { %1109 = vmatpush3.bf16.msra.mxu1 %v1108_v11  ;;  %v539_v11 = vld [vmem:[#allocation3 + $0x360] sm:$0xff] }
  0x82   :  { %1111 = vmatprep.subr.bf16.mxu1 %v1110_v12  ;;  %v1070_v12 = vpack.c.bf16 %v543_v6, %v540_v5 }
  0x85   :  { %1113 = vmatpush3.bf16.msra.mxu1 %v1112_v17  ;;  %v549_v17 = vld [vmem:[#allocation3 + $0x3b0] sm:$0xff] }
  0x86   :  { %1115 = vmatprep.subr.bf16.mxu1 %v1114_v18  ;;  %v1072_v18 = vpack.c.bf16 %v542_v13, %v539_v11  ;;  %v1074_v21 = vpack.c.bf16 %v549_v17, %v546_v16 }
  0x89   :  { %1117 = vmatpush3.bf16.msra.mxu1 %v1116_v23  ;;  %v547_v23 = vld [vmem:[#allocation3 + $0x3a0] sm:$0xff] }
  0x8a   :  { %1119 = vmatprep.subr.bf16.mxu1 %v1118_v24  ;;  %v550_v24 = vld [vmem:[#allocation3 + $0x3b8] sm:$0xff] }
  0x8b   :  { %v1136_v28 = vpack.c.bf16 %v550_v24, %v547_v23 }
  0x8d   :  { %1121 = vmatpush3.bf16.msra.mxu1 %v1120_v27  ;;  %v1076_v27 = vpack.c.bf16 %v548_v22, %v545_v20 }
  0x8e   :  { %1123 = vmatprep.subr.bf16.mxu1 %v1122_v35  ;;  %v1080_v35 = vpack.c.bf16 %v554_v30, %v551_v29 }
  0x91   :  { %1125 = vmatpush3.bf16.msra.mxu1 %v1124_v39  ;;  %v560_v39 = vld [vmem:[#allocation3 + $0x408] sm:$0xff] }
  0x92   :  { %1126 = vmatprep.subr.bf16.mxu1 %v1219_v43 }
 0x143   :  { %v356_v55 = vpop.f32.mrb[0].mxu1 }
 0x144   :  { %v358_v58 = vpop.f32.mrb[1].mxu1  ;;  %v357_v63 = vadd.f32 %v356_v55, %v265_v51  ;;  %v563_v51 = vld [vmem:[#allocation3 + $0x420] sm:$0xff]  ;;  %v568_v55 = vld [vmem:[#allocation3 + $0x448] sm:$0xff] }
 0x145   :  { %v359_v59 = vadd.f32 %v358_v58, %v269_v49  ;;  %v1084_v49 = vpack.c.bf16 %v560_v39, %v557_v37  ;;  %v272_v58 = vsub.s32 2, %v1538_v45 }
 0x147   :  { %656 = vmatprep.mubr.f32.mxu0 %v359_v59  ;;  %798 = vmatprep.mubr.f32.mxu1 %v359_v59  ;;  %v1553_v7 = vpop.f32.mrb[2].mxu1  ;;  %v1088_v59 = vpack.c.bf16 %v566_v53, %v563_v51  ;;  %v273_v3 = vrot.slane %v1544_v47, %v272_v58  ;;  %v575_v47 = vld [vmem:[%s1591_s4] sm:$0x7]  ;;  %s1220_s4 = smov [#allocation6]  }
 0x148   :  { %657 = vmatmul.mubr.f32.vlgmr.msra.gmra.mrb[0].mxu0 %v357_v63  ;;  %799 = vmatmul.mubr.f32.vlgmr.msra.gmra.mrb[4].mxu1 %v357_v63  ;;  %v962_v8 = vpop.f32.mrb[3].mxu1  ;;  %v572_v63 = vld [vmem:[#allocation3 + $0x468] sm:$0xff]  ;;  %v588_v11 = vrot.slane %v575_v47, %v272_v58  ;;  %s889_s10 = sshll.u32 %s1220_s4, 4  ;;  %s890_s10 = int_to_ptr.vmem [resolvable:$true] %s889_s10 }
 0x149   :  { %1065 = vmatpush1.bf16.msra.mxu0 %v1064_v60  ;;  %1128 = vmatpush3.bf16.msra.mxu1 %v1127_v61  ;;  %v1145_v60 = vpack.c.bf16 %v568_v55, %v565_v54  ;;  %v569_v61 = vld [vmem:[#allocation3 + $0x450] sm:$0xff]  ;;  %v428_v6 = vadd.f32 %v1553_v7, %v273_v3  ;;  %s1188_s3 = scalar_lea.vmem %s890_s10, 32  ;;  %p1193_p9 = scmp.lt.s32.totalorder %s890_s10, %s890_s10 }
 0x14a   :  { %1067 = vmatprep.subr.bf16.mxu0 %v1066_v1  ;;  %1129 = vmatprep.subr.bf16.mxu1 %v1219_v43  ;;  %v571_v1 = vld [vmem:[#allocation3 + $0x460] sm:$0xff]  ;;  %v1092_v4 = vpack.c.bf16 %v572_v63, %v569_v61  ;;  %p1189_p8 = scmp.ne.s32.totalorder %s890_s10, %s1188_s3  ;;  %p1194_p10 = scmp.lt.s32.totalorder %s1188_s3, %s1188_s3 }
 0x14b   :  { %727 = vmatprep.mubr.f32.mxu0 %v1217_v0  ;;  %995 = vmatprep.mubr.msk.f32.mxu1 %vm1218_vm4, %v1217_v0  ;;  %v1078_v0 = vpack.c.bf16 %v555_v26, %v552_v25  ;;  %v1148_v5 = vpack.c.bf16 %v574_v2, %v571_v1 }
 0x14c   :  { %p1195_p11 = por %p1194_p10, %p1193_p9 }
 0x14d   :  { %1069 = vmatpush1.bf16.msra.mxu0 %v1068_v9  ;;  %1131 = vmatpush3.bf16.msra.mxu1 %v1130_v10 }
 0x14e   :  { %1071 = vmatprep.subr.bf16.mxu0 %v1070_v12  ;;  %1132 = vmatprep.subr.bf16.mxu1 %v1219_v43  ;;  %v580_v12 = vrot.slane %v575_v47, %v264_v48  ;;  %p1196_p12 = pnand %p1195_p11, %p1189_p8 }
 0x151   :  { %1073 = vmatpush1.bf16.msra.mxu0 %v1072_v18  ;;  %1134 = vmatpush3.bf16.msra.mxu1 %v1133_v19 }
 0x152   :  { %1075 = vmatprep.subr.bf16.mxu0 %v1074_v21  ;;  %1135 = vmatprep.subr.bf16.mxu1 %v1219_v43  ;;  %v584_v21 = vrot.slane %v575_v47, %v268_v46 }
 0x155   :  { %1077 = vmatpush1.bf16.msra.mxu0 %v1076_v27  ;;  %1137 = vmatpush3.bf16.msra.mxu1 %v1136_v28 }
 0x156   :  { %1079 = vmatprep.subr.bf16.mxu0 %v1078_v0  ;;  %1138 = vmatprep.subr.bf16.mxu1 %v1219_v43 }
 0x159   :  { %1081 = vmatpush1.bf16.msra.mxu0 %v1080_v35  ;;  %1140 = vmatpush3.bf16.msra.mxu1 %v1139_v36 }
 0x15a   :  { %1083 = vmatprep.subr.bf16.mxu0 %v1082_v38  ;;  %1141 = vmatprep.subr.bf16.mxu1 %v1219_v43 }
 0x15d   :  { %1085 = vmatpush1.bf16.msra.mxu0 %v1084_v49  ;;  %1143 = vmatpush3.bf16.msra.mxu1 %v1142_v50 }
 0x15e   :  { %1087 = vmatprep.subr.bf16.mxu0 %v1086_v52  ;;  %1144 = vmatprep.subr.bf16.mxu1 %v1219_v43 }
 0x161   :  { %1089 = vmatpush1.bf16.msra.mxu0 %v1088_v59  ;;  %1146 = vmatpush3.bf16.msra.mxu1 %v1145_v60 }
 0x162   :  { %1091 = vmatprep.subr.bf16.mxu0 %v1090_v62  ;;  %1147 = vmatprep.subr.bf16.mxu1 %v1219_v43 }
 0x165   :  { %1093 = vmatpush1.bf16.msra.mxu0 %v1092_v4  ;;  %1149 = vmatpush3.bf16.msra.mxu1 %v1148_v5 }
 0x168   :  { %728 = vmatmul.mubr.f32.vlgmr.msra.gmra.mrb[0].mxu0 %v428_v6  ;;  %996 = vmatmul.mubr.f32.vlgmr.msra.gmra.mrb[6].mxu1 %v428_v6 }
 0x21b   :  { %v938_v8 = vpop.f32.mrb[4].mxu1 }
 0x21c   :  { %v939_v9 = vpop.f32.mrb[5].mxu1 }
 0x21d   :  { %v940_v10 = vadd.f32 %v939_v9, %v938_v8 }
 0x21f   :  { %v801_v13 = vadd.f32 %v940_v10, %v588_v11 }
 0x23b   :  { %v729_v14 = vpop.f32.mrb[0].mxu0  ;;  %v870_v43 = vpop.f32.mrb[6].mxu1 }
 0x23c   :  { %v1150_v15 = vadd.f32 %v729_v14, %v580_v12  ;;  %v871_v7 = vadd.f32 %v870_v43, %v801_v13  ;;  %v731_v16 = vpop.f32.mrb[1].mxu0  ;;  %v997_v17 = vpop.f32.mrb[7].mxu1 }
 0x23d   :  { %v1151_v22 = vadd.f32 %v731_v16, %v584_v21 }
 0x23e   :  { %v903_v18 = vmul.f32 -1.442695, %v1150_v15 }
 0x240   :  { %1162 = vpow2.f32 %v903_v18 }
 0x24a   :  { %v1163_v19 = vpop.eup %1162 }
 0x24b   :  { %v877_v20 = vadd.f32 1.0, %v1163_v19 }
 0x24d   :  { %1164 = vrcp.f32 %v877_v20 }
 0x257   :  { %v1165_v23 = vpop.eup %1164 }
 0x258   :  { %v880_v48 = vmul.f32 %v1165_v23, %v1151_v22 }
 0x25a   :  { %v881_v24 = vadd.f32 %v880_v48, %v871_v7 }
 0x25c   :  { %882 = vst [vmem:[#allocation6] sm:$0x3] %v881_v24 }
 0x25d   :  { %1199 = shalt.err (!%p1196_p12)
}
 0x25e   :  { %s1200_s13 = scalar_lea.hbm %s1592_s5, 32 }
 0x25f   :  { %p1201_p13 = scmp.ne.s32.totalorder %s1592_s5, %s1200_s13  ;;  %p1204_p0 = scmp.lt.u32.totalorder %s1200_s13, %s1592_s5 }
 0x261   :  { %p1206_p1 = pnand %p1204_p0, %p1201_p13 }
 0x263   :  { %1209 = shalt.err (!%p1206_p1)
}
 0x264   :  { %892 = dma.vmem_to_hbm [thread:$0]  %s890_s10, 32, %s1592_s5, [#allocation5]  }
 0x265   :  { %1212 = dma.done.wait [#allocation5], 32  }
 0x266   :  { %1213 = vsyncadd [#allocation5], 4294967264 }
 0x267   :  { %896 = vsyncpa [#allocation4], 1 }
 0x268   :  { %897 = vsyncpa [#allocation5], 1 }

</bundles_post_ra>
